<compile_context>
chip_gen: v6e
topology: v6e:2x2x1
jax: 0.10.0
libtpu: 0.0.40
codegen_flags: <defaults>
</compile_context>

<pallas_src>
import jax
import jax.numpy as jnp
from jax import lax
from jax.experimental import pallas as pl
from jax.experimental.pallas import tpu as pltpu


def _fused_bmm_kernel(x1_ref, v0_ref, x_ref, out_ref, acc_ref):
    """Grid: (B,).  Per step b:
         x1_ref : (M, K)    -- x1[b]
         v0_ref : (K, N)    -- v0[b] = x2[b].T
         x_ref  : (M, N)    -- x[b] = x1[b] @ v0[b]           (written per step)
         out_ref: (K, M, N) -- sum_b v0[b,k,n] * x[b,m,n]     (resident accumulator)
         acc_ref: (K, M, N) f32 scratch
    """
    b = pl.program_id(0)
    nb = pl.num_programs(0)

    # ---- first bmm on the MXU --------------------------------------------
    x_b = jnp.dot(x1_ref[...], v0_ref[...], preferred_element_type=jnp.float32)
    x_ref[...] = x_b.astype(x_ref.dtype)

    # ---- second bmm: contraction over the (small) batch axis --------------
    # Done as VPU broadcast-FMAs instead of a degenerate (K,B)@(B,M) matmul.
    @pl.when(b == 0)
    def _init():
        acc_ref[...] = jnp.zeros_like(acc_ref)

    K = v0_ref.shape[0]

    def body(k, carry):
        row = v0_ref[pl.ds(k, 1), :].astype(jnp.float32)   # (1, N), N in lanes
        acc_ref[k] += x_b * row                            # (M, N) FMA
        return carry

    lax.fori_loop(0, K, body, 0, unroll=(K <= 32))

    @pl.when(b == nb - 1)
    def _finalize():
        out_ref[...] = acc_ref[...].astype(out_ref.dtype)


def _fused_bmm(x1, v0, out_dtype):
    """Fused: (x = bmm(x1, v0),  out_kmn[k,m,n] = sum_b v0[b,k,n] * x[b,m,n])."""
    B, M, K = x1.shape
    assert v0.shape[0] == B and v0.shape[1] == K, (x1.shape, v0.shape)
    N = v0.shape[2]

    flops = 4 * B * M * N * K                                   # two matmul-equivalents
    bytes_accessed = 4 * (B * M * K + B * K * N + B * M * N + K * M * N)

    x_first, out_kmn = pl.pallas_call(
        _fused_bmm_kernel,
        out_shape=(
            jax.ShapeDtypeStruct((B, M, N), out_dtype),   # x = bmm(x1, v0)
            jax.ShapeDtypeStruct((K, M, N), out_dtype),   # second bmm, (k,m,n) layout
        ),
        grid_spec=pltpu.PrefetchScalarGridSpec(
            num_scalar_prefetch=0,
            grid=(B,),
            in_specs=[
                pl.BlockSpec((None, M, K), lambda b: (b, 0, 0)),   # x1[b]
                pl.BlockSpec((None, K, N), lambda b: (b, 0, 0)),   # v0[b]
            ],
            out_specs=(
                pl.BlockSpec((None, M, N), lambda b: (b, 0, 0)),   # x[b]
                pl.BlockSpec((K, M, N), lambda b: (0, 0, 0)),      # resident accumulator
            ),
            scratch_shapes=[pltpu.VMEM((K, M, N), jnp.float32)],
        ),
        compiler_params=pltpu.CompilerParams(
            dimension_semantics=("arbitrary",),   # batch axis is a reduction for `out`
        ),
        cost_estimate=pl.CostEstimate(
            flops=flops, transcendentals=0, bytes_accessed=bytes_accessed
        ),
    )(x1, v0)
    return x_first, out_kmn


def model_forward(x1, x2):
    B, M, K = x1.shape
    B2, N, K2 = x2.shape
    assert B == B2 and K == K2, (x1.shape, x2.shape)

    out_dtype = jnp.promote_types(x1.dtype, x2.dtype)

    v0 = jnp.transpose(x2, (0, 2, 1))             # (B, K, N)
    x_first, out_kmn = _fused_bmm(x1, v0, out_dtype)
    v1 = jnp.transpose(x_first, (2, 0, 1))        # (N, B, M)
    v2 = jnp.transpose(v0, (2, 1, 0))             # (N, K, B)
    out = jnp.transpose(out_kmn, (2, 0, 1))       # (N, K, M)
    return v0, v1, v2, out


if __name__ == "__main__":
    key = jax.random.PRNGKey(0)
    k1, k2 = jax.random.split(key)

    # Module uses x1: (1, 2, 2), x2: (1, 2, 2).  Generalized small shapes:
    # x1: (B, M, K), x2: (B, N, K)
    B, M, K, N = 2, 4, 8, 6
    x1 = jax.random.normal(k1, (B, M, K), dtype=jnp.float32)
    x2 = jax.random.normal(k2, (B, N, K), dtype=jnp.float32)

    fwd = jax.jit(model_forward)
    v0, v1, v2, out = fwd(x1, x2)
    jax.block_until_ready((v0, v1, v2, out))

    # Pure-JAX reference check of the full forward.
    v0_r = jnp.transpose(x2, (0, 2, 1))
    x_r = jnp.einsum("bmk,bkn->bmn", x1, v0_r)
    v1_r = jnp.transpose(x_r, (2, 0, 1))
    v2_r = jnp.transpose(v0_r, (2, 1, 0))
    out_r = jnp.einsum("nkb,nbm->nkm", v2_r, v1_r)

    assert v0.shape == (B, K, N) and v1.shape == (N, B, M)
    assert v2.shape == (N, K, B) and out.shape == (N, K, M)
    assert jnp.allclose(v0, v0_r, atol=1e-5)
    assert jnp.allclose(v1, v1_r, atol=1e-5)
    assert jnp.allclose(v2, v2_r, atol=1e-5)
    assert jnp.allclose(out, out_r, atol=1e-5)

    print("KERNEL_OK")
</pallas_src>

<mosaic_0001>
module attributes {stable_mosaic.version = 11 : i64} {
  func.func @_fused_bmm_kernel(%arg0: i32, %arg1: memref<1x4x8xf32, #tpu.memory_space<vmem>>, %arg2: memref<1x8x6xf32, #tpu.memory_space<vmem>>, %arg3: memref<1x4x6xf32, #tpu.memory_space<vmem>>, %arg4: memref<8x4x6xf32, #tpu.memory_space<vmem>>, %arg5: memref<8x4x6xf32, #tpu.memory_space<vmem>>) attributes {dimension_semantics = [#tpu.dimension_semantics<arbitrary>], iteration_bounds = array<i64: 2>, scalar_prefetch = 0 : i64, scratch_operands = 1 : i64, tpu.core_type = #tpu.core_type<tc>, window_params = [{transform_indices = @transform_0, window_bounds = array<i64: 1, 4, 8>}, {transform_indices = @transform_1, window_bounds = array<i64: 1, 8, 6>}, {transform_indices = @transform_2, window_bounds = array<i64: 1, 4, 6>}, {pipeline_mode = #tpu.pipeline_mode<synchronous>, transform_indices = @transform_3, window_bounds = array<i64: 8, 4, 6>}]} {
    %c0 = arith.constant 0 : index
    %c0_0 = arith.constant 0 : index
    %c0_1 = arith.constant 0 : index
    %0 = vector.load %arg1[%c0, %c0_0, %c0_1] : memref<1x4x8xf32, #tpu.memory_space<vmem>>, vector<1x4x8xf32>
    %1 = vector.shape_cast %0 : vector<1x4x8xf32> to vector<4x8xf32>
    %c0_2 = arith.constant 0 : index
    %c0_3 = arith.constant 0 : index
    %c0_4 = arith.constant 0 : index
    %2 = vector.load %arg2[%c0_2, %c0_3, %c0_4] : memref<1x8x6xf32, #tpu.memory_space<vmem>>, vector<1x8x6xf32>
    %3 = vector.shape_cast %2 : vector<1x8x6xf32> to vector<8x6xf32>
    %cst = arith.constant dense<0.000000e+00> : vector<4x6xf32>
    %4 = tpu.matmul %1, %3, %cst {dimension_numbers = #tpu.dot_dimension_numbers<[1], [0], [0], [1], [0, 0, 1, 1], [], []>} : vector<4x8xf32>, vector<8x6xf32>, vector<4x6xf32> -> vector<4x6xf32>
    %c0_5 = arith.constant 0 : index
    %c0_6 = arith.constant 0 : index
    %c0_7 = arith.constant 0 : index
    %5 = vector.load %arg3[%c0_5, %c0_6, %c0_7] : memref<1x4x6xf32, #tpu.memory_space<vmem>>, vector<1x4x6xf32>
    %6 = vector.shape_cast %5 : vector<1x4x6xf32> to vector<4x6xf32>
    %7 = vector.shape_cast %4 : vector<4x6xf32> to vector<1x4x6xf32>
    tpu.vector_store %arg3[%c0_5, %c0_6, %c0_7], %7 {strides = array<i32>} : memref<1x4x6xf32, #tpu.memory_space<vmem>>, vector<1x4x6xf32>,
    %c0_i32 = arith.constant 0 : i32
    %8 = arith.cmpi eq, %arg0, %c0_i32 : i32
    %9 = arith.extui %8 : i1 to i32
    %c0_i32_8 = arith.constant 0 : i32
    %10 = arith.cmpi ne, %9, %c0_i32_8 : i32
    scf.if %10 {
      %cst_60 = arith.constant 0.000000e+00 : f32
      %118 = vector.broadcast %cst_60 : f32 to vector<8x4x6xf32>
      %c0_61 = arith.constant 0 : index
      %c0_62 = arith.constant 0 : index
      %c0_63 = arith.constant 0 : index
      %119 = vector.load %arg5[%c0_61, %c0_62, %c0_63] : memref<8x4x6xf32, #tpu.memory_space<vmem>>, vector<8x4x6xf32>
      tpu.vector_store %arg5[%c0_61, %c0_62, %c0_63], %118 {strides = array<i32>} : memref<8x4x6xf32, #tpu.memory_space<vmem>>, vector<8x4x6xf32>,
    } else {
    }
    %c0_i32_9 = arith.constant 0 : i32
    %c0_10 = arith.constant 0 : index
    %11 = arith.index_cast %c0_i32_9 : i32 to index
    %c0_11 = arith.constant 0 : index
    %12 = vector.load %arg2[%c0_10, %11, %c0_11] : memref<1x8x6xf32, #tpu.memory_space<vmem>>, vector<1x1x6xf32>
    %13 = vector.shape_cast %12 : vector<1x1x6xf32> to vector<1x6xf32>
    %14 = arith.index_cast %c0_i32_9 : i32 to index
    %c0_12 = arith.constant 0 : index
    %c0_13 = arith.constant 0 : index
    %15 = vector.load %arg5[%14, %c0_12, %c0_13] : memref<8x4x6xf32, #tpu.memory_space<vmem>>, vector<1x4x6xf32>
    %16 = vector.shape_cast %15 : vector<1x4x6xf32> to vector<4x6xf32>
    %17 = vector.broadcast %13 : vector<1x6xf32> to vector<4x6xf32>
    %18 = arith.mulf %4, %17 : vector<4x6xf32>
    %19 = arith.addf %16, %18 : vector<4x6xf32>
    %20 = arith.index_cast %c0_i32_9 : i32 to index
    %c0_14 = arith.constant 0 : index
    %c0_15 = arith.constant 0 : index
    %21 = vector.load %arg5[%20, %c0_14, %c0_15] : memref<8x4x6xf32, #tpu.memory_space<vmem>>, vector<1x4x6xf32>
    %22 = vector.shape_cast %21 : vector<1x4x6xf32> to vector<4x6xf32>
    %23 = vector.shape_cast %19 : vector<4x6xf32> to vector<1x4x6xf32>
    tpu.vector_store %arg5[%20, %c0_14, %c0_15], %23 {strides = array<i32>} : memref<8x4x6xf32, #tpu.memory_space<vmem>>, vector<1x4x6xf32>,
    %c1_i32 = arith.constant 1 : i32
    %c0_16 = arith.constant 0 : index
    %24 = arith.index_cast %c1_i32 : i32 to index
    %c0_17 = arith.constant 0 : index
    %25 = vector.load %arg2[%c0_16, %24, %c0_17] : memref<1x8x6xf32, #tpu.memory_space<vmem>>, vector<1x1x6xf32>
    %26 = vector.shape_cast %25 : vector<1x1x6xf32> to vector<1x6xf32>
    %27 = arith.index_cast %c1_i32 : i32 to index
    %c0_18 = arith.constant 0 : index
    %c0_19 = arith.constant 0 : index
    %28 = vector.load %arg5[%27, %c0_18, %c0_19] : memref<8x4x6xf32, #tpu.memory_space<vmem>>, vector<1x4x6xf32>
    %29 = vector.shape_cast %28 : vector<1x4x6xf32> to vector<4x6xf32>
    %30 = vector.broadcast %26 : vector<1x6xf32> to vector<4x6xf32>
    %31 = arith.mulf %4, %30 : vector<4x6xf32>
    %32 = arith.addf %29, %31 : vector<4x6xf32>
    %33 = arith.index_cast %c1_i32 : i32 to index
    %c0_20 = arith.constant 0 : index
    %c0_21 = arith.constant 0 : index
    %34 = vector.load %arg5[%33, %c0_20, %c0_21] : memref<8x4x6xf32, #tpu.memory_space<vmem>>, vector<1x4x6xf32>
    %35 = vector.shape_cast %34 : vector<1x4x6xf32> to vector<4x6xf32>
    %36 = vector.shape_cast %32 : vector<4x6xf32> to vector<1x4x6xf32>
    tpu.vector_store %arg5[%33, %c0_20, %c0_21], %36 {strides = array<i32>} : memref<8x4x6xf32, #tpu.memory_space<vmem>>, vector<1x4x6xf32>,
    %c2_i32 = arith.constant 2 : i32
    %c0_22 = arith.constant 0 : index
    %37 = arith.index_cast %c2_i32 : i32 to index
    %c0_23 = arith.constant 0 : index
    %38 = vector.load %arg2[%c0_22, %37, %c0_23] : memref<1x8x6xf32, #tpu.memory_space<vmem>>, vector<1x1x6xf32>
    %39 = vector.shape_cast %38 : vector<1x1x6xf32> to vector<1x6xf32>
    %40 = arith.index_cast %c2_i32 : i32 to index
    %c0_24 = arith.constant 0 : index
    %c0_25 = arith.constant 0 : index
    %41 = vector.load %arg5[%40, %c0_24, %c0_25] : memref<8x4x6xf32, #tpu.memory_space<vmem>>, vector<1x4x6xf32>
    %42 = vector.shape_cast %41 : vector<1x4x6xf32> to vector<4x6xf32>
    %43 = vector.broadcast %39 : vector<1x6xf32> to vector<4x6xf32>
    %44 = arith.mulf %4, %43 : vector<4x6xf32>
    %45 = arith.addf %42, %44 : vector<4x6xf32>
    %46 = arith.index_cast %c2_i32 : i32 to index
    %c0_26 = arith.constant 0 : index
    %c0_27 = arith.constant 0 : index
    %47 = vector.load %arg5[%46, %c0_26, %c0_27] : memref<8x4x6xf32, #tpu.memory_space<vmem>>, vector<1x4x6xf32>
    %48 = vector.shape_cast %47 : vector<1x4x6xf32> to vector<4x6xf32>
    %49 = vector.shape_cast %45 : vector<4x6xf32> to vector<1x4x6xf32>
    tpu.vector_store %arg5[%46, %c0_26, %c0_27], %49 {strides = array<i32>} : memref<8x4x6xf32, #tpu.memory_space<vmem>>, vector<1x4x6xf32>,
    %c3_i32 = arith.constant 3 : i32
    %c0_28 = arith.constant 0 : index
    %50 = arith.index_cast %c3_i32 : i32 to index
    %c0_29 = arith.constant 0 : index
    %51 = vector.load %arg2[%c0_28, %50, %c0_29] : memref<1x8x6xf32, #tpu.memory_space<vmem>>, vector<1x1x6xf32>
    %52 = vector.shape_cast %51 : vector<1x1x6xf32> to vector<1x6xf32>
    %53 = arith.index_cast %c3_i32 : i32 to index
    %c0_30 = arith.constant 0 : index
    %c0_31 = arith.constant 0 : index
    %54 = vector.load %arg5[%53, %c0_30, %c0_31] : memref<8x4x6xf32, #tpu.memory_space<vmem>>, vector<1x4x6xf32>
    %55 = vector.shape_cast %54 : vector<1x4x6xf32> to vector<4x6xf32>
    %56 = vector.broadcast %52 : vector<1x6xf32> to vector<4x6xf32>
    %57 = arith.mulf %4, %56 : vector<4x6xf32>
    %58 = arith.addf %55, %57 : vector<4x6xf32>
    %59 = arith.index_cast %c3_i32 : i32 to index
    %c0_32 = arith.constant 0 : index
    %c0_33 = arith.constant 0 : index
    %60 = vector.load %arg5[%59, %c0_32, %c0_33] : memref<8x4x6xf32, #tpu.memory_space<vmem>>, vector<1x4x6xf32>
    %61 = vector.shape_cast %60 : vector<1x4x6xf32> to vector<4x6xf32>
    %62 = vector.shape_cast %58 : vector<4x6xf32> to vector<1x4x6xf32>
    tpu.vector_store %arg5[%59, %c0_32, %c0_33], %62 {strides = array<i32>} : memref<8x4x6xf32, #tpu.memory_space<vmem>>, vector<1x4x6xf32>,
    %c4_i32 = arith.constant 4 : i32
    %c0_34 = arith.constant 0 : index
    %63 = arith.index_cast %c4_i32 : i32 to index
    %c0_35 = arith.constant 0 : index
    %64 = vector.load %arg2[%c0_34, %63, %c0_35] : memref<1x8x6xf32, #tpu.memory_space<vmem>>, vector<1x1x6xf32>
    %65 = vector.shape_cast %64 : vector<1x1x6xf32> to vector<1x6xf32>
    %66 = arith.index_cast %c4_i32 : i32 to index
    %c0_36 = arith.constant 0 : index
    %c0_37 = arith.constant 0 : index
    %67 = vector.load %arg5[%66, %c0_36, %c0_37] : memref<8x4x6xf32, #tpu.memory_space<vmem>>, vector<1x4x6xf32>
    %68 = vector.shape_cast %67 : vector<1x4x6xf32> to vector<4x6xf32>
    %69 = vector.broadcast %65 : vector<1x6xf32> to vector<4x6xf32>
    %70 = arith.mulf %4, %69 : vector<4x6xf32>
    %71 = arith.addf %68, %70 : vector<4x6xf32>
    %72 = arith.index_cast %c4_i32 : i32 to index
    %c0_38 = arith.constant 0 : index
    %c0_39 = arith.constant 0 : index
    %73 = vector.load %arg5[%72, %c0_38, %c0_39] : memref<8x4x6xf32, #tpu.memory_space<vmem>>, vector<1x4x6xf32>
    %74 = vector.shape_cast %73 : vector<1x4x6xf32> to vector<4x6xf32>
    %75 = vector.shape_cast %71 : vector<4x6xf32> to vector<1x4x6xf32>
    tpu.vector_store %arg5[%72, %c0_38, %c0_39], %75 {strides = array<i32>} : memref<8x4x6xf32, #tpu.memory_space<vmem>>, vector<1x4x6xf32>,
    %c5_i32 = arith.constant 5 : i32
    %c0_40 = arith.constant 0 : index
    %76 = arith.index_cast %c5_i32 : i32 to index
    %c0_41 = arith.constant 0 : index
    %77 = vector.load %arg2[%c0_40, %76, %c0_41] : memref<1x8x6xf32, #tpu.memory_space<vmem>>, vector<1x1x6xf32>
    %78 = vector.shape_cast %77 : vector<1x1x6xf32> to vector<1x6xf32>
    %79 = arith.index_cast %c5_i32 : i32 to index
    %c0_42 = arith.constant 0 : index
    %c0_43 = arith.constant 0 : index
    %80 = vector.load %arg5[%79, %c0_42, %c0_43] : memref<8x4x6xf32, #tpu.memory_space<vmem>>, vector<1x4x6xf32>
    %81 = vector.shape_cast %80 : vector<1x4x6xf32> to vector<4x6xf32>
    %82 = vector.broadcast %78 : vector<1x6xf32> to vector<4x6xf32>
    %83 = arith.mulf %4, %82 : vector<4x6xf32>
    %84 = arith.addf %81, %83 : vector<4x6xf32>
    %85 = arith.index_cast %c5_i32 : i32 to index
    %c0_44 = arith.constant 0 : index
    %c0_45 = arith.constant 0 : index
    %86 = vector.load %arg5[%85, %c0_44, %c0_45] : memref<8x4x6xf32, #tpu.memory_space<vmem>>, vector<1x4x6xf32>
    %87 = vector.shape_cast %86 : vector<1x4x6xf32> to vector<4x6xf32>
    %88 = vector.shape_cast %84 : vector<4x6xf32> to vector<1x4x6xf32>
    tpu.vector_store %arg5[%85, %c0_44, %c0_45], %88 {strides = array<i32>} : memref<8x4x6xf32, #tpu.memory_space<vmem>>, vector<1x4x6xf32>,
    %c6_i32 = arith.constant 6 : i32
    %c0_46 = arith.constant 0 : index
    %89 = arith.index_cast %c6_i32 : i32 to index
    %c0_47 = arith.constant 0 : index
    %90 = vector.load %arg2[%c0_46, %89, %c0_47] : memref<1x8x6xf32, #tpu.memory_space<vmem>>, vector<1x1x6xf32>
    %91 = vector.shape_cast %90 : vector<1x1x6xf32> to vector<1x6xf32>
    %92 = arith.index_cast %c6_i32 : i32 to index
    %c0_48 = arith.constant 0 : index
    %c0_49 = arith.constant 0 : index
    %93 = vector.load %arg5[%92, %c0_48, %c0_49] : memref<8x4x6xf32, #tpu.memory_space<vmem>>, vector<1x4x6xf32>
    %94 = vector.shape_cast %93 : vector<1x4x6xf32> to vector<4x6xf32>
    %95 = vector.broadcast %91 : vector<1x6xf32> to vector<4x6xf32>
    %96 = arith.mulf %4, %95 : vector<4x6xf32>
    %97 = arith.addf %94, %96 : vector<4x6xf32>
    %98 = arith.index_cast %c6_i32 : i32 to index
    %c0_50 = arith.constant 0 : index
    %c0_51 = arith.constant 0 : index
    %99 = vector.load %arg5[%98, %c0_50, %c0_51] : memref<8x4x6xf32, #tpu.memory_space<vmem>>, vector<1x4x6xf32>
    %100 = vector.shape_cast %99 : vector<1x4x6xf32> to vector<4x6xf32>
    %101 = vector.shape_cast %97 : vector<4x6xf32> to vector<1x4x6xf32>
    tpu.vector_store %arg5[%98, %c0_50, %c0_51], %101 {strides = array<i32>} : memref<8x4x6xf32, #tpu.memory_space<vmem>>, vector<1x4x6xf32>,
    %c7_i32 = arith.constant 7 : i32
    %c0_52 = arith.constant 0 : index
    %102 = arith.index_cast %c7_i32 : i32 to index
    %c0_53 = arith.constant 0 : index
    %103 = vector.load %arg2[%c0_52, %102, %c0_53] : memref<1x8x6xf32, #tpu.memory_space<vmem>>, vector<1x1x6xf32>
    %104 = vector.shape_cast %103 : vector<1x1x6xf32> to vector<1x6xf32>
    %105 = arith.index_cast %c7_i32 : i32 to index
    %c0_54 = arith.constant 0 : index
    %c0_55 = arith.constant 0 : index
    %106 = vector.load %arg5[%105, %c0_54, %c0_55] : memref<8x4x6xf32, #tpu.memory_space<vmem>>, vector<1x4x6xf32>
    %107 = vector.shape_cast %106 : vector<1x4x6xf32> to vector<4x6xf32>
    %108 = vector.broadcast %104 : vector<1x6xf32> to vector<4x6xf32>
    %109 = arith.mulf %4, %108 : vector<4x6xf32>
    %110 = arith.addf %107, %109 : vector<4x6xf32>
    %111 = arith.index_cast %c7_i32 : i32 to index
    %c0_56 = arith.constant 0 : index
    %c0_57 = arith.constant 0 : index
    %112 = vector.load %arg5[%111, %c0_56, %c0_57] : memref<8x4x6xf32, #tpu.memory_space<vmem>>, vector<1x4x6xf32>
    %113 = vector.shape_cast %112 : vector<1x4x6xf32> to vector<4x6xf32>
    %114 = vector.shape_cast %110 : vector<4x6xf32> to vector<1x4x6xf32>
    tpu.vector_store %arg5[%111, %c0_56, %c0_57], %114 {strides = array<i32>} : memref<8x4x6xf32, #tpu.memory_space<vmem>>, vector<1x4x6xf32>,
    %c8_i32 = arith.constant 8 : i32
    %c1_i32_58 = arith.constant 1 : i32
    %115 = arith.cmpi eq, %arg0, %c1_i32_58 : i32
    %116 = arith.extui %115 : i1 to i32
    %c0_i32_59 = arith.constant 0 : i32
    %117 = arith.cmpi ne, %116, %c0_i32_59 : i32
    scf.if %117 {
      %c0_60 = arith.constant 0 : index
      %c0_61 = arith.constant 0 : index
      %c0_62 = arith.constant 0 : index
      %118 = vector.load %arg5[%c0_60, %c0_61, %c0_62] : memref<8x4x6xf32, #tpu.memory_space<vmem>>, vector<8x4x6xf32>
      %c0_63 = arith.constant 0 : index
      %c0_64 = arith.constant 0 : index
      %c0_65 = arith.constant 0 : index
      %119 = vector.load %arg4[%c0_63, %c0_64, %c0_65] : memref<8x4x6xf32, #tpu.memory_space<vmem>>, vector<8x4x6xf32>
      tpu.vector_store %arg4[%c0_63, %c0_64, %c0_65], %118 {strides = array<i32>} : memref<8x4x6xf32, #tpu.memory_space<vmem>>, vector<8x4x6xf32>,
    } else {
    }
    return
  }
  func.func @transform_0(%arg0: i32) -> (i32, i32, i32) {
    %c0_i32 = arith.constant 0 : i32
    %c0_i32_0 = arith.constant 0 : i32
    %c0_i32_1 = arith.constant 0 : i32
    return %arg0, %c0_i32, %c0_i32_0 : i32, i32, i32
  }
  func.func @transform_1(%arg0: i32) -> (i32, i32, i32) {
    %c0_i32 = arith.constant 0 : i32
    %c0_i32_0 = arith.constant 0 : i32
    %c0_i32_1 = arith.constant 0 : i32
    return %arg0, %c0_i32, %c0_i32_0 : i32, i32, i32
  }
  func.func @transform_2(%arg0: i32) -> (i32, i32, i32) {
    %c0_i32 = arith.constant 0 : i32
    %c0_i32_0 = arith.constant 0 : i32
    %c0_i32_1 = arith.constant 0 : i32
    return %arg0, %c0_i32, %c0_i32_0 : i32, i32, i32
  }
  func.func @transform_3(%arg0: i32) -> (i32, i32, i32) {
    %c0_i32 = arith.constant 0 : i32
    %c0_i32_0 = arith.constant 0 : i32
    %c0_i32_1 = arith.constant 0 : i32
    %c0_i32_2 = arith.constant 0 : i32
    return %c0_i32, %c0_i32_0, %c0_i32_1 : i32, i32, i32
  }
}

</mosaic_0001>

<bundles_post_ra>
// kernel: model_forward.1
= control target key start
LH: loop header
LB: loop body
LE: loop exit
PB: predicated region body
PF: predicated region fallthrough
CT: control target
= control target key end

     0   :  { %9 = vsyncpa [#allocation4], 0  ;;  %s781_s0 = inlined_call_operand.vmem [shape: f32[2,4,8], index: 0, kind: input, shape index: {}]   ;;  %s782_s1 = inlined_call_operand.vmem [shape: f32[2,8,6], index: 1, kind: input, shape index: {}]   ;;  %s783_s2 = inlined_call_operand.hbm [shape: f32[2,4,6], index: 2, kind: output, shape index: {0}]   ;;  %s784_s3 = inlined_call_operand.vmem [shape: f32[8,4,6], index: 3, kind: output, shape index: {1}]  }
   0x1   :  { %11 = vsyncpa [#allocation4 + $0x1], 0  ;;  %s618_s12 = smov 0   ;;  %s620_s13 = smov 0  }
   0x2   :  { %s622_s14 = smov 0   ;;  %s624_s15 = smov 0  }
   0x3 LB: > { %s639_s16 = sadd.s32 4294967295, %s592_s15   ;;  %s461_s17 = sadd.s32 4294967294, %s592_s15   ;;  %s592_s15 = sphi %s624_s15, %s790_s15   ;;  %s588_s14 = sphi %s622_s14, %s789_s14   ;;  %s584_s13 = sphi %s620_s13, %s788_s13   ;;  %s580_s12 = sphi %s618_s12, %s787_s12  }
   0x4   : > { %s643_s18 = sadd.s32 1, %s592_s15   ;;  %s76_s19 = sadd.s32 1, %s588_s14 }
   0x5   : > { %s73_s20 = ssub.s32 %s592_s15, %s643_s18  ;;  %p86_p0 = scmp.ne.s32.totalorder %s588_s14, %s584_s13 }
   0x6   : > { %p74_p1 = scmp.eq.s32.totalorder %s73_s20, 0  ;;  %p87_p2 = scmp.eq.s32.totalorder %s639_s16, 1 }
   0x7   : > { %p92_p3 = scmp.ne.s32.totalorder %s584_s13, %s580_s12  ;;  %p93_p4 = scmp.eq.s32.totalorder %s461_s17, 1 }
   0x8   : > { %s654_s21 = scalar_select %p74_p1, %s588_s14, %s76_s19  }
   0x9   : > { %p656_p5 = por %p87_p2, %p86_p0  ;;  %p660_p6 = por %p93_p4, %p92_p3 }
   0xa   : > { %p464_p7 = scmp.ge.s32.totalorder %s592_s15, 1  ;;  %p146_p8 = scmp.lt.s32.totalorder %s592_s15, 3 }
   0xc   : > { %p147_p9 = pnand %p464_p7, %p146_p8 }
   0xd   : > { %p173_p10 = scmp.lt.s32.totalorder (!%p147_p9), %s639_s16, 1  ;;  %s168_s6 = sand.u32 (!%p147_p9), 1, %s584_s13  }
   0xe   : > { %150 = sbr.rel (%p147_p9) target bundleno = 267 (0x10b), region = 28  ;;  %s680_s7 = sshll.u32 (!%p147_p9), %s168_s6, 2 }
   0xf   : > { %s170_s8 = scalar_lea.vmem (!%p147_p9), [#allocation3], %s680_s7  ;;  %p469_p11 = scmp.ne.s32.totalorder (!%p147_p9), %s639_s16, 0 }
  0x13   : > { %v594_v0 = vmov 0.0   ;;  %vm595_vm0 = vmmov 0   ;;  %s174_s24 = scalar_select %p173_p10, %s639_s16, 1  ;;  %vm183_vm1 = vcmask 64512   ;;  %vm257_vm2 = vcmask 44032  }
  0x14   : > { %485 = vmatprep.subr.mxu0 %v594_v0  ;;  %487 = vmatprep.mubr.msk.f32.mxu0 %vm595_vm0, %v594_v0 }
  0x15   : > { %s467_s25 = sshll.u32 %s174_s24, 3  ;;  %s466_s26 = sshll.u32 %s174_s24, 2 }
  0x16   : > { %s671_s29 = scalar_lea.vmem %s782_s1, %s467_s25  ;;  %s176_s5 = scalar_lea.vmem %s781_s0, %s466_s26 }
  0x17   : > { %v182_v1 = vld [vmem:[%s671_s29] sm:$0xff] }
  0x18   : > { %v181_v2 = vld [vmem:[%s176_s5] sm:$0xf]  ;;  %486 = vmatpush3.msra.mxu0 %v182_v1 }
  0x19   : > { %488 = vmatmul.mubr.msk.f32.vlgmr.msra.gmra.mxu0 %vm183_vm1, %v181_v2 }
  0xd7   : > { %262 = sbr.rel (%p469_p11) target bundleno = 225 (0xe1), region = 32 }
  0xd9   : > { %v253_v3 = vpop.f32.mrf.mxu0 }
  0xda   : > { %258 = vst.msk [vmem:[%s170_s8] sm:$0xf] %vm257_vm2, %v253_v3 }
  0xdb   : > { %v489_v4 = vpop.f32.mrf.mxu0 }
  0xdc   : > { %v596_v5 = vmov 0.0  }
  0xdd   : > { %263 = vst.msk [vmem:[#allocation2] sm:$0xf] %vm257_vm2, %v596_v5  ;;  %264 = vst.msk [vmem:[#allocation2 + $0x4] sm:$0xf] %vm257_vm2, %v596_v5 }
  0xde   : > { %265 = vst.msk [vmem:[#allocation2 + $0x8] sm:$0xf] %vm257_vm2, %v596_v5  ;;  %266 = vst.msk [vmem:[#allocation2 + $0xc] sm:$0xf] %vm257_vm2, %v596_v5 }
  0xdf   : > { %267 = vst.msk [vmem:[#allocation2 + $0x10] sm:$0xf] %vm257_vm2, %v596_v5  ;;  %268 = vst.msk [vmem:[#allocation2 + $0x14] sm:$0xf] %vm257_vm2, %v596_v5 }
  0xe0   : > { %269 = vst.msk [vmem:[#allocation2 + $0x18] sm:$0xf] %vm257_vm2, %v596_v5  ;;  %270 = vst.msk [vmem:[#allocation2 + $0x1c] sm:$0xf] %vm257_vm2, %v596_v5 }
  0xe1 PF: > { %v470_v6 = vld [vmem:[%s671_s29] ss:$0 sm:$0xff]  ;;  %v471_v8 = vld [vmem:[%s671_s29 + $0x1] ss:$0 sm:$0xff]  ;;  %v472_v12 = vld [vmem:[%s671_s29 + $0x2] ss:$0 sm:$0xff] }
  0xe2   : > { %v277_v9 = vmul.f32 %v470_v6, %v253_v3  ;;  %v287_v11 = vmul.f32 %v471_v8, %v253_v3  ;;  %v297_v14 = vmul.f32 %v472_v12, %v253_v3  ;;  %v473_v15 = vld [vmem:[%s671_s29 + $0x3] ss:$0 sm:$0xff]  ;;  %v474_v17 = vld [vmem:[%s671_s29 + $0x4] ss:$0 sm:$0xff]  ;;  %v475_v23 = vld [vmem:[%s671_s29 + $0x5] ss:$0 sm:$0xff] }
  0xe3   : > { %v307_v20 = vmul.f32 %v473_v15, %v253_v3  ;;  %v317_v22 = vmul.f32 %v474_v17, %v253_v3  ;;  %v327_v26 = vmul.f32 %v475_v23, %v253_v3  ;;  %v476_v27 = vld [vmem:[%s671_s29 + $0x6] ss:$0 sm:$0xff]  ;;  %v477_v29 = vld [vmem:[%s671_s29 + $0x7] ss:$0 sm:$0xff]  ;;  %p478_p12 = scmp.ne.s32.totalorder %s639_s16, 1 }
  0xe4   : > { %v272_v7 = vld [vmem:[#allocation2] sm:$0xf]  ;;  %v282_v10 = vld [vmem:[#allocation2 + $0x4] sm:$0xf]  ;;  %v337_v32 = vmul.f32 %v476_v27, %v253_v3  ;;  %v347_v34 = vmul.f32 %v477_v29, %v253_v3 }
  0xe5   : > { %v292_v13 = vld [vmem:[#allocation2 + $0x8] sm:$0xf]  ;;  %v302_v16 = vld [vmem:[#allocation2 + $0xc] sm:$0xf]  ;;  %v278_v18 = vadd.f32 %v277_v9, %v272_v7  ;;  %v288_v19 = vadd.f32 %v287_v11, %v282_v10 }
  0xe6   : > { %v312_v21 = vld [vmem:[#allocation2 + $0x10] sm:$0xf]  ;;  %v322_v24 = vld [vmem:[#allocation2 + $0x14] sm:$0xf]  ;;  %v298_v25 = vadd.f32 %v297_v14, %v292_v13  ;;  %v308_v30 = vadd.f32 %v307_v20, %v302_v16 }
  0xe7   : > { %v332_v28 = vld [vmem:[#allocation2 + $0x18] sm:$0xf]  ;;  %279 = vst.msk [vmem:[#allocation2] sm:$0xf] %vm257_vm2, %v278_v18  ;;  %289 = vst.msk [vmem:[#allocation2 + $0x4] sm:$0xf] %vm257_vm2, %v288_v19  ;;  %v318_v31 = vadd.f32 %v317_v22, %v312_v21  ;;  %v328_v35 = vadd.f32 %v327_v26, %v322_v24 }
  0xe8   : > { %v342_v33 = vld [vmem:[#allocation2 + $0x1c] sm:$0xf]  ;;  %299 = vst.msk [vmem:[#allocation2 + $0x8] sm:$0xf] %vm257_vm2, %v298_v25  ;;  %309 = vst.msk [vmem:[#allocation2 + $0xc] sm:$0xf] %vm257_vm2, %v308_v30  ;;  %v338_v36 = vadd.f32 %v337_v32, %v332_v28 }
  0xe9   : > { %319 = vst.msk [vmem:[#allocation2 + $0x10] sm:$0xf] %vm257_vm2, %v318_v31  ;;  %v348_v37 = vadd.f32 %v347_v34, %v342_v33  ;;  %329 = vst.msk [vmem:[#allocation2 + $0x14] sm:$0xf] %vm257_vm2, %v328_v35  ;;  %353 = sbr.rel (%p478_p12) target bundleno = 244 (0xf4), region = 36 }
  0xea   : > { %339 = vst.msk [vmem:[#allocation2 + $0x18] sm:$0xf] %vm257_vm2, %v338_v36 }
  0xeb   : > { %349 = vst.msk [vmem:[#allocation2 + $0x1c] sm:$0xf] %vm257_vm2, %v348_v37 }
  0xee   : > { %v354_v38 = vld [vmem:[#allocation2] sm:$0xf]  ;;  %v355_v39 = vld [vmem:[#allocation2 + $0x4] sm:$0xf] }
  0xef   : > { %v356_v40 = vld [vmem:[#allocation2 + $0x8] sm:$0xf]  ;;  %362 = vst.msk [vmem:[%s784_s3] sm:$0xf] %vm257_vm2, %v354_v38  ;;  %363 = vst.msk [vmem:[%s784_s3 + $0x4] sm:$0xf] %vm257_vm2, %v355_v39 }
  0xf0   : > { %364 = vst.msk [vmem:[%s784_s3 + $0x8] sm:$0xf] %vm257_vm2, %v356_v40  ;;  %v357_v41 = vld [vmem:[#allocation2 + $0xc] sm:$0xf]  ;;  %v358_v42 = vld [vmem:[#allocation2 + $0x10] sm:$0xf] }
  0xf1   : > { %v359_v43 = vld [vmem:[#allocation2 + $0x14] sm:$0xf]  ;;  %365 = vst.msk [vmem:[%s784_s3 + $0xc] sm:$0xf] %vm257_vm2, %v357_v41  ;;  %366 = vst.msk [vmem:[%s784_s3 + $0x10] sm:$0xf] %vm257_vm2, %v358_v42 }
  0xf2   : > { %367 = vst.msk [vmem:[%s784_s3 + $0x14] sm:$0xf] %vm257_vm2, %v359_v43  ;;  %v360_v44 = vld [vmem:[#allocation2 + $0x18] sm:$0xf]  ;;  %v361_v45 = vld [vmem:[#allocation2 + $0x1c] sm:$0xf] }
  0xf3   : > { %368 = vst.msk [vmem:[%s784_s3 + $0x18] sm:$0xf] %vm257_vm2, %v360_v44  ;;  %369 = vst.msk [vmem:[%s784_s3 + $0x1c] sm:$0xf] %vm257_vm2, %v361_v45 }
  0xf4 PF: > { %s480_s10 = sshll.u32 %s639_s16, 6  ;;  %s384_s20 = sshll.u32 %s170_s8, 4  ;;  %s385_s20 = int_to_ptr.vmem [resolvable:$true] %s384_s20 }
  0xf5   : > { %s382_s19 = scalar_lea.hbm %s783_s2, %s480_s10  ;;  %s371_s24 = scalar_lea.sflag [#allocation4], %s168_s6 }
  0xf6   : > { %s532_s25 = scalar_lea.vmem %s385_s20, 64  ;;  %s597_s26 = smov [#allocation3]  }
  0xf7   : > { %p533_p13 = scmp.ne.s32.totalorder %s385_s20, %s532_s25  ;;  %s536_s27 = sshll.u32 %s597_s26, 4  ;;  %s537_s27 = int_to_ptr.vmem [resolvable:$false] %s536_s27 }
  0xf8   : > { %s538_s28 = scalar_lea.vmem %s537_s27, 128  ;;  %p539_p2 = scmp.lt.s32.totalorder %s385_s20, %s537_s27 }
  0xf9   : > { %p534_p0 = pnand %p533_p13, %p656_p5  ;;  %p540_p3 = scmp.lt.s32.totalorder %s538_s28, %s532_s25 }
  0xfb   : > { %p535_p1 = pneg %p534_p0  ;;  %p541_p4 = por %p540_p3, %p539_p2 }
  0xfd   : > { %p542_p7 = pnand %p541_p4, %p535_p1 }
  0xff   : > { %545 = shalt.err (!%p542_p7)
}
 0x100   : > { %s546_s16 = scalar_lea.hbm %s382_s19, 64  ;;  %s550_s8 = scalar_lea.hbm %s783_s2, 128 }
 0x101   : > { %p547_p8 = scmp.ne.s32.totalorder %s382_s19, %s546_s16  ;;  %p551_p11 = scmp.lt.s32.totalorder %s382_s19, %s783_s2 }
 0x102   : > { %p552_p12 = scmp.lt.s32.totalorder %s550_s8, %s546_s16 }
 0x103   : > { %p548_p9 = pnand %p547_p8, %p656_p5 }
 0x104   : > { %p553_p13 = por %p552_p12, %p551_p11 }
 0x105   : > { %p549_p10 = pneg %p548_p9 }
 0x107   : > { %p554_p0 = pnand %p553_p13, %p549_p10 }
 0x109   : > { %557 = shalt.err (!%p554_p0)
}
 0x10a   : > { %490 = dma.vmem_to_hbm [thread:$0]  (%p656_p5), %s385_s20, 64, %s382_s19, %s371_s24  }
 0x10b PF: > { %p496_p1 = scmp.ge.s32.totalorder %s592_s15, 2  ;;  %s402_s4 = sand.u32 1, %s580_s12  }
 0x10c   : > { %s403_s5 = scalar_lea.sflag [#allocation4], %s402_s4 }
 0x10d   : > { %p493_p2 = pnand %p496_p1, %p660_p6 }
 0x10f   : > { %p494_p3 = pneg %p493_p2 }
 0x111   : > { %575 = dma.done.wait (%p494_p3), %s403_s5, 64  }
 0x112   : > { %577 = vsyncadd (%p494_p3), %s403_s5, 4294967232  ;;  %p14_p4 = scmp.ge.s32.totalorder %s643_s18, 4   ;;  %s787_s12 = smov %s584_s13 }
 0x113   : > { %s788_s13 = smov %s588_s14  ;;  %s789_s14 = smov %s654_s21 }
 0x114   : > { %s790_s15 = smov %s643_s18  ;;  %16 = sbr.rel (!%p14_p4) target bundleno = 3 (0x3), region = 89 }
 0x119   :  { %408 = vsyncpa [#allocation4], 1 }
 0x11a   :  { %410 = vsyncpa [#allocation4 + $0x1], 1 }

</bundles_post_ra>
